<compile_context>
chip_gen: v7x
topology: tpu7x:2x2x1
jax: 0.10.0
libtpu: 0.0.40
codegen_flags: <defaults>
</compile_context>

<pallas_src>
import jax
import jax.numpy as jnp
from jax.experimental import pallas as pl
from jax.experimental.pallas import tpu as pltpu

NUM_CLASSES = 3
OUT_PAD = 128  # lane-dense output slab


def _cdiv(a, b):
    return -(-a // b)


def _make_kernel(tp, t_out2, h):
    """tp: padded time rows per example; t_out2: valid conv2 positions; h: hidden."""

    def kernel(xwin_ref, w1_ref, b1_ref, w2_ref, b2_ref,
               wl1_ref, bl1_ref, wl2_ref, bl2_ref, out_ref):
        bt = out_ref.shape[0]          # batch tile
        h2w = 2 * h                    # fused (premise|hypo) channel width

        # ---- conv1 (both branches fused), emitted directly as conv2's im2col ----
        # xwin: (bt*tp, K2*2E) bf16,  w1: (K2*2E, K*2H) bf16  -> f32
        h1 = jnp.dot(xwin_ref[...], w1_ref[...],
                     preferred_element_type=jnp.float32)
        h1 = jnp.maximum(h1 + b1_ref[...], 0.0)          # (bt*tp, K*2H)

        # ---- conv2 (both branches fused) ----
        a2 = jnp.dot(h1.astype(jnp.bfloat16), w2_ref[...],
                     preferred_element_type=jnp.float32)
        a2 = jnp.maximum(a2 + b2_ref[...], 0.0)          # (bt*tp, 2H)

        # ---- max over time (per example) ----
        a2 = a2.reshape(bt, tp, h2w)                     # tp is a multiple of 8
        if t_out2 < tp:  # static: zero-mask padded rows (post-ReLU so 0 is neutral)
            t_idx = jax.lax.broadcasted_iota(jnp.int32, a2.shape, 1)
            a2 = jnp.where(t_idx < t_out2, a2, 0.0)
        maxed = jnp.max(a2, axis=1)                      # (bt, 2H)

        # ---- 'mul' interaction + MLP head ----
        joint = maxed[:, :h] * maxed[:, h:]              # (bt, H)
        lin1 = jnp.dot(joint.astype(jnp.bfloat16), wl1_ref[...],
                       preferred_element_type=jnp.float32) + bl1_ref[...]
        lin1 = jnp.maximum(lin1, 0.0)                    # (bt, LH)
        out_ref[...] = jnp.dot(lin1.astype(jnp.bfloat16), wl2_ref[...],
                               preferred_element_type=jnp.float32) + bl2_ref[...]

    return kernel


def prepare_weights(params):
    """One-time weight preparation, hoisted out of the per-call path.

    Builds the block-diagonal premise/hypo fused conv weights, composes conv1
    with the K time-shifts conv2 needs (so conv1's matmul emits conv2's im2col),
    tiles biases, lane-pads the final logits weights, and casts to bf16.
    """
    f32, bf16 = jnp.float32, jnp.bfloat16
    H, E, K = params["p_w1"].shape          # (Cout, Cin, K)
    LH = params["l1_w"].shape[0]
    C2, H2 = 2 * E, 2 * H
    K2 = 2 * K - 1

    def kio(w):                              # (Cout, Cin, K) -> (K, Cin, Cout)
        return jnp.transpose(w, (2, 1, 0)).astype(f32)

    W1f = jnp.zeros((K, C2, H2), f32)
    W1f = W1f.at[:, :E, :H].set(kio(params["p_w1"]))
    W1f = W1f.at[:, E:, H:].set(kio(params["h_w1"]))
    b1f = jnp.concatenate([params["p_b1"], params["h_b1"]]).astype(f32)

    W2f = jnp.zeros((K, H2, H2), f32)
    W2f = W2f.at[:, :H, :H].set(kio(params["p_w2"]))
    W2f = W2f.at[:, H:, H:].set(kio(params["h_w2"]))
    b2f = jnp.concatenate([params["p_b2"], params["h_b2"]]).astype(f32)

    # Compose conv1 with the K time-shifts conv2 needs:
    #   h1_all[t, j*H2 + o] == relu(conv1)[t + j, o]  -> conv2's im2col, for free.
    W1_big = jnp.zeros((K2, C2, K, H2), f32)
    for j in range(K):
        W1_big = W1_big.at[j:j + K, :, j, :].set(W1f)
    W1_big = W1_big.reshape(K2 * C2, K * H2).astype(bf16)
    b1_big = jnp.tile(b1f, (K,)).reshape(1, K * H2)

    W2_flat = W2f.reshape(K * H2, H2).astype(bf16)
    b2_row = b2f.reshape(1, H2)

    # MLP head (lane-dense padded logits)
    Wl1 = params["l1_w"].T.astype(bf16)                                    # (H, LH)
    bl1 = params["l1_b"].reshape(1, LH).astype(f32)
    Wl2 = jnp.zeros((LH, OUT_PAD), f32).at[:, :NUM_CLASSES].set(
        params["l2_w"].T.astype(f32)).astype(bf16)
    bl2 = jnp.zeros((1, OUT_PAD), f32).at[:, :NUM_CLASSES].set(
        params["l2_b"].astype(f32))

    lut = params["lookup_table"].astype(f32)
    weights = (W1_big, b1_big, W2_flat, b2_row, Wl1, bl1, Wl2, bl2)
    meta = dict(H=H, E=E, K=K, LH=LH)
    return lut, weights, meta


def _choose_batch_tile(B, TP, x_row_bytes, *, target_rows=512,
                       x_vmem_budget=16 << 20):
    """Pick (batch_tile, grid_steps) per the perf review.

      * BT*TP >= ~target_rows when the batch allows (fill the 256-row MXU,
        amortize the ~0.35us/step grid overhead).
      * single grid step for small batches (1-TC chips: multi-step = pure bubble).
      * BT capped by a double-buffered x-slab VMEM budget (v7x: 64 MiB total).
      * even step count when >1 so both v7x TensorCores get equal work.
    """
    bt_target = _cdiv(target_rows, TP)
    bt_vmem = max(8, x_vmem_budget // (2 * TP * x_row_bytes))
    bt = int(min(bt_target, bt_vmem))
    if bt >= B:
        return B, 1                                   # one step, one big DMA
    bt = max(8, (bt // 8) * 8)                        # (8,128) rule on out block
    steps = _cdiv(B, bt)
    if steps > 1 and steps % 2 == 1:                  # v7x TC parity
        bt2 = _cdiv(_cdiv(B, steps + 1), 8) * 8
        steps2 = _cdiv(B, bt2)
        if steps2 % 2 == 0:
            bt, steps = bt2, steps2
    return bt, steps


def snli_forward(premise_tok, hypo_tok, premise_len, hypo_len,
                 lut, weights, meta, *, batch_tile=None):
    """Embedding gather + im2col layout in XLA, then one gridded pallas_call."""
    del premise_len, hypo_len   # CNN branch ignores lengths (same as torch CNN.forward)

    bf16 = jnp.bfloat16
    H, E, K = meta["H"], meta["E"], meta["K"]
    B, T = premise_tok.shape
    C2 = 2 * E
    H2 = 2 * H
    K2 = 2 * K - 1                          # receptive field of the 2-layer stack
    T_OUT2 = T - 2 * (K - 1)                # valid positions after both convs
    assert T_OUT2 >= 1
    TP = max(8, _cdiv(T_OUT2, 8) * 8)       # multiple-of-8 time rows per example

    (W1_big, b1_big, W2_flat, b2_row, Wl1, bl1, Wl2, bl2) = weights

    # ---- embedding lookup + premise/hypo channel concat (branch fusion) ----
    emb_cat = jnp.concatenate([lut[premise_tok], lut[hypo_tok]], axis=-1)  # (B,T,2E)

    # ---- wrapper-side im2col over the full 2-layer receptive field ----
    pad_t = TP + K2 - 1 - T
    emb_pad = jnp.pad(emb_cat, ((0, 0), (0, pad_t), (0, 0)))
    x_win = jnp.concatenate([emb_pad[:, j:j + TP, :] for j in range(K2)], axis=-1)
    # x_win[b, t, j*C2 + c] == emb_cat[b, t + j, c]                    (B, TP, K2*2E)

    # ---- batch tiling ----
    x_row_bytes = K2 * C2 * 2   # bf16 bytes per flattened row
    if batch_tile is None:
        BT, steps = _choose_batch_tile(B, TP, x_row_bytes)
    else:
        BT = min(batch_tile, B)
        steps = _cdiv(B, BT)
        if steps > 1:
            BT = _cdiv(BT, 8) * 8           # keep (BT, OUT_PAD) block legal
            steps = _cdiv(B, BT)
    BP = BT * steps

    x_flat = x_win.reshape(B * TP, K2 * C2)
    if BP != B:
        x_flat = jnp.pad(x_flat, ((0, (BP - B) * TP), (0, 0)))
    x_flat = x_flat.astype(bf16)

    # ---- explicit per-step VMEM budget -> vmem_limit_bytes ----
    weight_bytes = sum(int(w.size) * w.dtype.itemsize for w in weights)
    x_block = BT * TP * x_row_bytes
    out_block = BT * OUT_PAD * 4
    interm = BT * TP * (K * H2 + H2) * 4            # h1 + a2 f32 intermediates
    vmem_est = 2 * x_block + 2 * out_block + 2 * weight_bytes + interm
    vmem_limit = int(min(max(2 * vmem_est, 32 << 20), 48 << 20))  # v7x-safe cap

    kernel = _make_kernel(TP, T_OUT2, H)

    def full(arr):   # whole-array block, constant index_map (resident weights)
        return pl.BlockSpec(arr.shape, lambda i: (0,) * arr.ndim)

    out_padded = pl.pallas_call(
        kernel,
        out_shape=jax.ShapeDtypeStruct((BP, OUT_PAD), jnp.float32),
        grid=(steps,),
        in_specs=[
            pl.BlockSpec((BT * TP, K2 * C2), lambda i: (i, 0)),
            full(W1_big), full(b1_big), full(W2_flat), full(b2_row),
            full(Wl1), full(bl1), full(Wl2), full(bl2),
        ],
        out_specs=pl.BlockSpec((BT, OUT_PAD), lambda i: (i, 0)),
        compiler_params=pltpu.CompilerParams(
            dimension_semantics=("parallel",),
            vmem_limit_bytes=vmem_limit),
    )(x_flat, W1_big, b1_big, W2_flat, b2_row, Wl1, bl1, Wl2, bl2)

    return out_padded[:B, :NUM_CLASSES]


def snli_reference(premise_tok, hypo_tok, params):
    """Pure-JAX f32 reference mirroring the PyTorch ops (NCW conv, max over time)."""
    lut = params["lookup_table"]

    def cnn(tok, w1, b1, w2, b2):
        emb = lut[tok].astype(jnp.float32)              # (B, T, E)
        x = jnp.transpose(emb, (0, 2, 1))               # (B, E, T)  -- NCW like torch
        h = jax.lax.conv_general_dilated(
            x, w1, (1,), 'VALID', dimension_numbers=('NCH', 'OIH', 'NCH'))
        h = jnp.maximum(h + b1[None, :, None], 0.0)
        h = jax.lax.conv_general_dilated(
            h, w2, (1,), 'VALID', dimension_numbers=('NCH', 'OIH', 'NCH'))
        h = jnp.maximum(h + b2[None, :, None], 0.0)
        return jnp.max(h, axis=2)                       # max over time -> (B, H)

    p = cnn(premise_tok, params["p_w1"], params["p_b1"], params["p_w2"], params["p_b2"])
    hh = cnn(hypo_tok, params["h_w1"], params["h_b1"], params["h_w2"], params["h_b2"])
    joint = p * hh
    lh = jnp.maximum(joint @ params["l1_w"].T + params["l1_b"], 0.0)
    return lh @ params["l2_w"].T + params["l2_b"]


if __name__ == "__main__":
    # Small shapes consistent with the module.
    B, T = 16, 12
    VOCAB, EMBED = 50, 32
    PREMISE_HIDDEN = 32          # hypo_net also uses premise_hidden_size (as in torch)
    LINEAR_HIDDEN = 32
    K = 3

    key = jax.random.PRNGKey(0)
    keys = jax.random.split(key, 16)

    params = {
        "lookup_table": jax.random.normal(keys[0], (VOCAB, EMBED), jnp.float32),
        # premise CNN: Conv1d(E, H, K), Conv1d(H, H, K)
        "p_w1": 0.1 * jax.random.normal(keys[1], (PREMISE_HIDDEN, EMBED, K), jnp.float32),
        "p_b1": 0.1 * jax.random.normal(keys[2], (PREMISE_HIDDEN,), jnp.float32),
        "p_w2": 0.1 * jax.random.normal(keys[3], (PREMISE_HIDDEN, PREMISE_HIDDEN, K), jnp.float32),
        "p_b2": 0.1 * jax.random.normal(keys[4], (PREMISE_HIDDEN,), jnp.float32),
        # hypo CNN (same hidden size, as in the torch __init__)
        "h_w1": 0.1 * jax.random.normal(keys[5], (PREMISE_HIDDEN, EMBED, K), jnp.float32),
        "h_b1": 0.1 * jax.random.normal(keys[6], (PREMISE_HIDDEN,), jnp.float32),
        "h_w2": 0.1 * jax.random.normal(keys[7], (PREMISE_HIDDEN, PREMISE_HIDDEN, K), jnp.float32),
        "h_b2": 0.1 * jax.random.normal(keys[8], (PREMISE_HIDDEN,), jnp.float32),
        # MLP head: Linear(H, Lh), Linear(Lh, 3)  (interaction_type='mul' -> hidden = H)
        "l1_w": 0.1 * jax.random.normal(keys[9], (LINEAR_HIDDEN, PREMISE_HIDDEN), jnp.float32),
        "l1_b": 0.1 * jax.random.normal(keys[10], (LINEAR_HIDDEN,), jnp.float32),
        "l2_w": 0.1 * jax.random.normal(keys[11], (NUM_CLASSES, LINEAR_HIDDEN), jnp.float32),
        "l2_b": 0.1 * jax.random.normal(keys[12], (NUM_CLASSES,), jnp.float32),
    }

    premise = jax.random.randint(keys[13], (B, T), 0, VOCAB)
    hypo = jax.random.randint(keys[14], (B, T), 0, VOCAB)
    premise_len = jnp.full((B,), T, jnp.int32)
    hypo_len = jnp.full((B,), T, jnp.int32)

    # One-time weight prep (hoisted out of the per-call path), then a jitted
    # forward so the wrapper gather/pad/concat fuses with the kernel launch.
    lut, weights, meta = prepare_weights(params)
    weights = jax.tree_util.tree_map(jax.block_until_ready, weights)

    fwd = jax.jit(lambda p, h, pln, hln: snli_forward(p, h, pln, hln,
                                                      lut, weights, meta))
    out = fwd(premise, hypo, premise_len, hypo_len)
    out = jax.block_until_ready(out)

    ref = snli_reference(premise, hypo, params)
    assert out.shape == (B, NUM_CLASSES)
    # bf16 matmul inputs (f32 accumulation) -> loosened tolerance vs. the f32 reference.
    assert jnp.allclose(out, ref, atol=5e-2, rtol=5e-2), (out, ref)

    print("KERNEL_OK")
</pallas_src>

<mosaic_0001>
module attributes {stable_mosaic.version = 11 : i64} {
  func.func @kernel(%arg0: i32, %arg1: memref<128x320xbf16, #tpu.memory_space<vmem>>, %arg2: memref<320x192xbf16, #tpu.memory_space<vmem>>, %arg3: memref<1x192xf32, #tpu.memory_space<vmem>>, %arg4: memref<192x64xbf16, #tpu.memory_space<vmem>>, %arg5: memref<1x64xf32, #tpu.memory_space<vmem>>, %arg6: memref<32x32xbf16, #tpu.memory_space<vmem>>, %arg7: memref<1x32xf32, #tpu.memory_space<vmem>>, %arg8: memref<32x128xbf16, #tpu.memory_space<vmem>>, %arg9: memref<1x128xf32, #tpu.memory_space<vmem>>, %arg10: memref<16x128xf32, #tpu.memory_space<vmem>>) attributes {dimension_semantics = [#tpu.dimension_semantics<parallel>], iteration_bounds = array<i64: 1>, scalar_prefetch = 0 : i64, scratch_operands = 0 : i64, tpu.core_type = #tpu.core_type<tc>, window_params = [{transform_indices = @transform_0, window_bounds = array<i64: 128, 320>}, {pipeline_mode = #tpu.pipeline_mode<synchronous>, transform_indices = @transform_1, window_bounds = array<i64: 320, 192>}, {pipeline_mode = #tpu.pipeline_mode<synchronous>, transform_indices = @transform_2, window_bounds = array<i64: 1, 192>}, {pipeline_mode = #tpu.pipeline_mode<synchronous>, transform_indices = @transform_3, window_bounds = array<i64: 192, 64>}, {pipeline_mode = #tpu.pipeline_mode<synchronous>, transform_indices = @transform_4, window_bounds = array<i64: 1, 64>}, {pipeline_mode = #tpu.pipeline_mode<synchronous>, transform_indices = @transform_5, window_bounds = array<i64: 32, 32>}, {pipeline_mode = #tpu.pipeline_mode<synchronous>, transform_indices = @transform_6, window_bounds = array<i64: 1, 32>}, {pipeline_mode = #tpu.pipeline_mode<synchronous>, transform_indices = @transform_7, window_bounds = array<i64: 32, 128>}, {pipeline_mode = #tpu.pipeline_mode<synchronous>, transform_indices = @transform_8, window_bounds = array<i64: 1, 128>}, {transform_indices = @transform_9, window_bounds = array<i64: 16, 128>}]} {
    %c0 = arith.constant 0 : index
    %c0_0 = arith.constant 0 : index
    %0 = vector.load %arg1[%c0, %c0_0] : memref<128x320xbf16, #tpu.memory_space<vmem>>, vector<128x320xbf16>
    %c0_1 = arith.constant 0 : index
    %c0_2 = arith.constant 0 : index
    %1 = vector.load %arg2[%c0_1, %c0_2] : memref<320x192xbf16, #tpu.memory_space<vmem>>, vector<320x192xbf16>
    %cst = arith.constant dense<0.000000e+00> : vector<128x192xf32>
    %2 = tpu.matmul %0, %1, %cst {dimension_numbers = #tpu.dot_dimension_numbers<[1], [0], [0], [1], [0, 0, 1, 1], [], []>} : vector<128x320xbf16>, vector<320x192xbf16>, vector<128x192xf32> -> vector<128x192xf32>
    %c0_3 = arith.constant 0 : index
    %c0_4 = arith.constant 0 : index
    %3 = vector.load %arg3[%c0_3, %c0_4] : memref<1x192xf32, #tpu.memory_space<vmem>>, vector<1x192xf32>
    %4 = vector.broadcast %3 : vector<1x192xf32> to vector<128x192xf32>
    %5 = arith.addf %2, %4 : vector<128x192xf32>
    %cst_5 = arith.constant 0.000000e+00 : f32
    %6 = vector.broadcast %cst_5 : f32 to vector<128x192xf32>
    %7 = arith.maximumf %5, %6 : vector<128x192xf32>
    %8 = arith.truncf %7 : vector<128x192xf32> to vector<128x192xbf16>
    %c0_6 = arith.constant 0 : index
    %c0_7 = arith.constant 0 : index
    %9 = vector.load %arg4[%c0_6, %c0_7] : memref<192x64xbf16, #tpu.memory_space<vmem>>, vector<192x64xbf16>
    %cst_8 = arith.constant dense<0.000000e+00> : vector<128x64xf32>
    %10 = tpu.matmul %8, %9, %cst_8 {dimension_numbers = #tpu.dot_dimension_numbers<[1], [0], [0], [1], [0, 0, 1, 1], [], []>} : vector<128x192xbf16>, vector<192x64xbf16>, vector<128x64xf32> -> vector<128x64xf32>
    %c0_9 = arith.constant 0 : index
    %c0_10 = arith.constant 0 : index
    %11 = vector.load %arg5[%c0_9, %c0_10] : memref<1x64xf32, #tpu.memory_space<vmem>>, vector<1x64xf32>
    %12 = vector.broadcast %11 : vector<1x64xf32> to vector<128x64xf32>
    %13 = arith.addf %10, %12 : vector<128x64xf32>
    %cst_11 = arith.constant 0.000000e+00 : f32
    %14 = vector.broadcast %cst_11 : f32 to vector<128x64xf32>
    %15 = arith.maximumf %13, %14 : vector<128x64xf32>
    %16 = vector.shape_cast %15 : vector<128x64xf32> to vector<16x8x64xf32>
    %cst_12 = arith.constant dense<0xFF800000> : vector<16x64xf32>
    %17 = vector.multi_reduction <maximumf>, %16, %cst_12 [1] : vector<16x8x64xf32> to vector<16x64xf32>
    %18 = vector.extract_strided_slice %17 {offsets = [0, 0], sizes = [16, 32], strides = [1, 1]} : vector<16x64xf32> to vector<16x32xf32>
    %19 = vector.extract_strided_slice %17 {offsets = [0, 32], sizes = [16, 32], strides = [1, 1]} : vector<16x64xf32> to vector<16x32xf32>
    %20 = arith.mulf %18, %19 : vector<16x32xf32>
    %21 = arith.truncf %20 : vector<16x32xf32> to vector<16x32xbf16>
    %c0_13 = arith.constant 0 : index
    %c0_14 = arith.constant 0 : index
    %22 = vector.load %arg6[%c0_13, %c0_14] : memref<32x32xbf16, #tpu.memory_space<vmem>>, vector<32x32xbf16>
    %cst_15 = arith.constant dense<0.000000e+00> : vector<16x32xf32>
    %23 = tpu.matmul %21, %22, %cst_15 {dimension_numbers = #tpu.dot_dimension_numbers<[1], [0], [0], [1], [0, 0, 1, 1], [], []>} : vector<16x32xbf16>, vector<32x32xbf16>, vector<16x32xf32> -> vector<16x32xf32>
    %c0_16 = arith.constant 0 : index
    %c0_17 = arith.constant 0 : index
    %24 = vector.load %arg7[%c0_16, %c0_17] : memref<1x32xf32, #tpu.memory_space<vmem>>, vector<1x32xf32>
    %25 = vector.broadcast %24 : vector<1x32xf32> to vector<16x32xf32>
    %26 = arith.addf %23, %25 : vector<16x32xf32>
    %cst_18 = arith.constant 0.000000e+00 : f32
    %27 = vector.broadcast %cst_18 : f32 to vector<16x32xf32>
    %28 = arith.maximumf %26, %27 : vector<16x32xf32>
    %29 = arith.truncf %28 : vector<16x32xf32> to vector<16x32xbf16>
    %c0_19 = arith.constant 0 : index
    %c0_20 = arith.constant 0 : index
    %30 = vector.load %arg8[%c0_19, %c0_20] : memref<32x128xbf16, #tpu.memory_space<vmem>>, vector<32x128xbf16>
    %cst_21 = arith.constant dense<0.000000e+00> : vector<16x128xf32>
    %31 = tpu.matmul %29, %30, %cst_21 {dimension_numbers = #tpu.dot_dimension_numbers<[1], [0], [0], [1], [0, 0, 1, 1], [], []>} : vector<16x32xbf16>, vector<32x128xbf16>, vector<16x128xf32> -> vector<16x128xf32>
    %c0_22 = arith.constant 0 : index
    %c0_23 = arith.constant 0 : index
    %32 = vector.load %arg9[%c0_22, %c0_23] : memref<1x128xf32, #tpu.memory_space<vmem>>, vector<1x128xf32>
    %33 = vector.broadcast %32 : vector<1x128xf32> to vector<16x128xf32>
    %34 = arith.addf %31, %33 : vector<16x128xf32>
    %c0_24 = arith.constant 0 : index
    %c0_25 = arith.constant 0 : index
    %35 = vector.load %arg10[%c0_24, %c0_25] : memref<16x128xf32, #tpu.memory_space<vmem>>, vector<16x128xf32>
    tpu.vector_store %arg10[%c0_24, %c0_25], %34 {strides = array<i32>} : memref<16x128xf32, #tpu.memory_space<vmem>>, vector<16x128xf32>,
    return
  }
  func.func @transform_0(%arg0: i32) -> (i32, i32) {
    %c0_i32 = arith.constant 0 : i32
    %c0_i32_0 = arith.constant 0 : i32
    return %arg0, %c0_i32 : i32, i32
  }
  func.func @transform_1(%arg0: i32) -> (i32, i32) {
    %c0_i32 = arith.constant 0 : i32
    %c0_i32_0 = arith.constant 0 : i32
    %c0_i32_1 = arith.constant 0 : i32
    return %c0_i32, %c0_i32_0 : i32, i32
  }
  func.func @transform_2(%arg0: i32) -> (i32, i32) {
    %c0_i32 = arith.constant 0 : i32
    %c0_i32_0 = arith.constant 0 : i32
    %c0_i32_1 = arith.constant 0 : i32
    return %c0_i32, %c0_i32_0 : i32, i32
  }
  func.func @transform_3(%arg0: i32) -> (i32, i32) {
    %c0_i32 = arith.constant 0 : i32
    %c0_i32_0 = arith.constant 0 : i32
    %c0_i32_1 = arith.constant 0 : i32
    return %c0_i32, %c0_i32_0 : i32, i32
  }
  func.func @transform_4(%arg0: i32) -> (i32, i32) {
    %c0_i32 = arith.constant 0 : i32
    %c0_i32_0 = arith.constant 0 : i32
    %c0_i32_1 = arith.constant 0 : i32
    return %c0_i32, %c0_i32_0 : i32, i32
  }
  func.func @transform_5(%arg0: i32) -> (i32, i32) {
    %c0_i32 = arith.constant 0 : i32
    %c0_i32_0 = arith.constant 0 : i32
    %c0_i32_1 = arith.constant 0 : i32
    return %c0_i32, %c0_i32_0 : i32, i32
  }
  func.func @transform_6(%arg0: i32) -> (i32, i32) {
    %c0_i32 = arith.constant 0 : i32
    %c0_i32_0 = arith.constant 0 : i32
    %c0_i32_1 = arith.constant 0 : i32
    return %c0_i32, %c0_i32_0 : i32, i32
  }
  func.func @transform_7(%arg0: i32) -> (i32, i32) {
    %c0_i32 = arith.constant 0 : i32
    %c0_i32_0 = arith.constant 0 : i32
    %c0_i32_1 = arith.constant 0 : i32
    return %c0_i32, %c0_i32_0 : i32, i32
  }
  func.func @transform_8(%arg0: i32) -> (i32, i32) {
    %c0_i32 = arith.constant 0 : i32
    %c0_i32_0 = arith.constant 0 : i32
    %c0_i32_1 = arith.constant 0 : i32
    return %c0_i32, %c0_i32_0 : i32, i32
  }
  func.func @transform_9(%arg0: i32) -> (i32, i32) {
    %c0_i32 = arith.constant 0 : i32
    %c0_i32_0 = arith.constant 0 : i32
    return %arg0, %c0_i32 : i32, i32
  }
}

</mosaic_0001>

<bundles_post_ra>
// kernel: _lambda_.1
= control target key start
LH: loop header
LB: loop body
LE: loop exit
PB: predicated region body
PF: predicated region fallthrough
CT: control target
= control target key end

     0   :  { %v1703_v1 = vmov 0   ;;  %vm437_vm0 = vcmask 523264   ;;  %vm1706_vm1 = vmmov 0   ;;  %vm1228_vm2 = vcmask 1041409   ;;  %s2307_s1 = inlined_call_operand.vmem [shape: bf16[320,192], index: 1, kind: input, shape index: {}]   ;;  %s2308_s0 = inlined_call_operand.vmem [shape: bf16[128,320], index: 0, kind: input, shape index: {}]   ;;  %s2309_s3 = inlined_call_operand.vmem [shape: bf16[192,64], index: 3, kind: input, shape index: {}]   ;;  %s2310_s2 = inlined_call_operand.vmem [shape: f32[1,192], index: 2, kind: input, shape index: {}]   ;;  %s2311_s4 = inlined_call_operand.vmem [shape: f32[1,64], index: 4, kind: input, shape index: {}]   ;;  %s2312_s5 = inlined_call_operand.vmem [shape: bf16[32,32], index: 5, kind: input, shape index: {}]   ;;  %s2313_s7 = inlined_call_operand.vmem [shape: bf16[32,128], index: 7, kind: input, shape index: {}]   ;;  %s2314_s6 = inlined_call_operand.vmem [shape: f32[1,32], index: 6, kind: input, shape index: {}]   ;;  %s2315_s8 = inlined_call_operand.vmem [shape: f32[1,128], index: 8, kind: input, shape index: {}]   ;;  %s2316_s9 = inlined_call_operand.vmem [shape: f32[16,128], index: 9, kind: output, shape index: {}]  }
   0x1   :  { %v1595_v0 = vld [vmem:[%s2307_s1 + $0x4] ss:$8 sps:$4 sm:$0xff]   ;;  %627 = vmatprep.mubr.bf16.mxu1 %v1703_v1  ;;  %v1597_v2 = vld [vmem:[%s2307_s1] ss:$8 sps:$4 sm:$0xff]   ;;  %v1598_v3 = vld [vmem:[%s2307_s1 + $0x14] ss:$8 sps:$4 sm:$0xff]  }
   0x2   :  { %462 = vmatprep.subr.bf16.mxu0 %v1595_v0  ;;  %v1600_v4 = vld [vmem:[%s2307_s1 + $0x10] ss:$8 sps:$4 sm:$0xff]   ;;  %v1601_v5 = vld [vmem:[%s2307_s1 + $0x24] ss:$8 sps:$4 sm:$0xff]   ;;  %v1603_v6 = vld [vmem:[%s2307_s1 + $0x20] ss:$8 sps:$4 sm:$0xff]  }
   0x3   :  { %463 = vmatpush1.bf16.msra.mxu0 %v1597_v2  ;;  %v1604_v7 = vld [vmem:[%s2307_s1 + $0x34] ss:$8 sps:$4 sm:$0xff]   ;;  %v1606_v8 = vld [vmem:[%s2307_s1 + $0x30] ss:$8 sps:$4 sm:$0xff]   ;;  %v1607_v9 = vld [vmem:[%s2307_s1 + $0x44] ss:$8 sps:$4 sm:$0xff]  }
   0x4   :  { %464 = vmatprep.subr.bf16.mxu0 %v1598_v3  ;;  %v1609_v10 = vld [vmem:[%s2307_s1 + $0x40] ss:$8 sps:$4 sm:$0xff]   ;;  %v1610_v11 = vld [vmem:[%s2307_s1 + $0x54] ss:$8 sps:$4 sm:$0xff]   ;;  %v1612_v12 = vld [vmem:[%s2307_s1 + $0x50] ss:$8 sps:$4 sm:$0xff]  }
   0x5   :  { %v1613_v13 = vld [vmem:[%s2307_s1 + $0x64] ss:$8 sps:$4 sm:$0xff]   ;;  %v1615_v14 = vld [vmem:[%s2307_s1 + $0x60] ss:$8 sps:$4 sm:$0xff]   ;;  %v1616_v15 = vld [vmem:[%s2307_s1 + $0x74] ss:$8 sps:$4 sm:$0xff]  }
   0x6   :  { %v1645_v16 = vld [vmem:[%s2308_s0 + $0x4] ss:$12 sps:$4 sm:$0xff]   ;;  %v1809_v17 = vld [vmem:[%s2307_s1 + $0x100] ss:$8 sps:$4 sm:$0xff]   ;;  %v1819_v19 = vld [vmem:[%s2307_s1 + $0x114] ss:$8 sps:$4 sm:$0xff]  }
   0x7   :  { %465 = vmatpush1.bf16.msra.mxu0 %v1600_v4  ;;  %v1814_v18 = vld [vmem:[%s2307_s1 + $0x104] ss:$8 sps:$4 sm:$0xff]   ;;  %494 = vmatprep.mubr.bf16.mxu0 %v1645_v16  ;;  %v1826_v20 = vld [vmem:[%s2307_s1 + $0x110] ss:$8 sps:$4 sm:$0xff]   ;;  %v1621_v24 = vld [vmem:[%s2307_s1 + $0x80] ss:$8 sps:$4 sm:$0xff]  }
   0x8   :  { %466 = vmatprep.subr.bf16.mxu0 %v1601_v5  ;;  %1519 = vmatprep.subr.bf16.mxu1 %v1814_v18  ;;  %v1618_v21 = vld [vmem:[%s2307_s1 + $0x70] ss:$8 sps:$4 sm:$0xff]   ;;  %v1835_v22 = vld [vmem:[%s2307_s1 + $0x124] ss:$8 sps:$4 sm:$0xff]   ;;  %v1847_v25 = vld [vmem:[%s2307_s1 + $0x120] ss:$8 sps:$4 sm:$0xff]  }
   0x9   :  { %1523 = vmatpush1.bf16.msra.mxu1 %v1809_v17  ;;  %v1619_v23 = vld [vmem:[%s2307_s1 + $0x84] ss:$8 sps:$4 sm:$0xff]   ;;  %v1853_v26 = vld [vmem:[%s2307_s1 + $0x134] ss:$8 sps:$4 sm:$0xff]   ;;  %v1862_v28 = vld [vmem:[%s2307_s1 + $0x130] ss:$8 sps:$4 sm:$0xff]  }
   0xa   :  { %1520 = vmatprep.subr.bf16.mxu1 %v1819_v19  ;;  %v1622_v27 = vld [vmem:[%s2307_s1 + $0x94] ss:$8 sps:$4 sm:$0xff]   ;;  %v1624_v29 = vld [vmem:[%s2307_s1 + $0x90] ss:$8 sps:$4 sm:$0xff]   ;;  %v1625_v30 = vld [vmem:[%s2307_s1 + $0xa4] ss:$8 sps:$4 sm:$0xff]  }
   0xb   :  { %467 = vmatpush1.bf16.msra.mxu0 %v1603_v6  ;;  %v1664_v31 = vld [vmem:[%s2308_s0 + $0x38] ss:$12 sps:$4 sm:$0xff]   ;;  %v1627_v32 = vld [vmem:[%s2307_s1 + $0xa0] ss:$8 sps:$4 sm:$0xff]   ;;  %v1628_v33 = vld [vmem:[%s2307_s1 + $0xb4] ss:$8 sps:$4 sm:$0xff]  }
   0xc   :  { %468 = vmatprep.subr.bf16.mxu0 %v1604_v7  ;;  %v1630_v34 = vld [vmem:[%s2307_s1 + $0xb0] ss:$8 sps:$4 sm:$0xff]   ;;  %v1631_v35 = vld [vmem:[%s2307_s1 + $0xc4] ss:$8 sps:$4 sm:$0xff]   ;;  %v1633_v37 = vld [vmem:[%s2307_s1 + $0xc0] ss:$8 sps:$4 sm:$0xff]  }
   0xd   :  { %1524 = vmatpush1.bf16.msra.mxu1 %v1826_v20  ;;  %v1668_v36 = vld [vmem:[%s2308_s0 + $0x50] ss:$12 sps:$4 sm:$0xff]   ;;  %v1637_v40 = vld [vmem:[%s2307_s1 + $0xe4] ss:$8 sps:$4 sm:$0xff]   ;;  %v1672_v41 = vld [vmem:[%s2308_s0 + $0x68] ss:$12 sps:$4 sm:$0xff]  }
   0xe   :  { %1521 = vmatprep.subr.bf16.mxu1 %v1835_v22  ;;  %v1634_v38 = vld [vmem:[%s2307_s1 + $0xd4] ss:$8 sps:$4 sm:$0xff]   ;;  %v1636_v39 = vld [vmem:[%s2307_s1 + $0xd0] ss:$8 sps:$4 sm:$0xff]   ;;  %v1639_v42 = vld [vmem:[%s2307_s1 + $0xe0] ss:$8 sps:$4 sm:$0xff]  }
   0xf   :  { %469 = vmatpush1.bf16.msra.mxu0 %v1606_v8  ;;  %v1640_v43 = vld [vmem:[%s2307_s1 + $0xf4] ss:$8 sps:$4 sm:$0xff]   ;;  %v1642_v44 = vld [vmem:[%s2307_s1 + $0xf0] ss:$8 sps:$4 sm:$0xff]   ;;  %v1676_v45 = vld [vmem:[%s2308_s0 + $0x80] ss:$12 sps:$4 sm:$0xff]  }
  0x10   :  { %470 = vmatprep.subr.bf16.mxu0 %v1607_v9  ;;  %v1643_v46 = vld [vmem:[%s2308_s0] ss:$12 sps:$4 sm:$0xff]   ;;  %v1651_v47 = vld [vmem:[%s2308_s0 + $0x1c] ss:$12 sps:$4 sm:$0xff]   ;;  %v1680_v48 = vld [vmem:[%s2308_s0 + $0x98] ss:$12 sps:$4 sm:$0xff]  }
  0x11   :  { %1525 = vmatpush1.bf16.msra.mxu1 %v1847_v25  ;;  %v1654_v49 = vld [vmem:[%s2308_s0 + $0x18] ss:$12 sps:$4 sm:$0xff]   ;;  %v1660_v50 = vld [vmem:[%s2308_s0 + $0x34] ss:$12 sps:$4 sm:$0xff]   ;;  %v1684_v51 = vld [vmem:[%s2308_s0 + $0xb0] ss:$12 sps:$4 sm:$0xff]  }
  0x12   :  { %1522 = vmatprep.subr.bf16.mxu1 %v1853_v26  ;;  %v1663_v52 = vld [vmem:[%s2308_s0 + $0x30] ss:$12 sps:$4 sm:$0xff]   ;;  %v1665_v53 = vld [vmem:[%s2308_s0 + $0x4c] ss:$12 sps:$4 sm:$0xff]   ;;  %v1667_v54 = vld [vmem:[%s2308_s0 + $0x48] ss:$12 sps:$4 sm:$0xff]  }
  0x13   :  { %471 = vmatpush1.bf16.msra.mxu0 %v1609_v10  ;;  %v1669_v55 = vld [vmem:[%s2308_s0 + $0x64] ss:$12 sps:$4 sm:$0xff]   ;;  %v1671_v56 = vld [vmem:[%s2308_s0 + $0x60] ss:$12 sps:$4 sm:$0xff]   ;;  %v1673_v57 = vld [vmem:[%s2308_s0 + $0x7c] ss:$12 sps:$4 sm:$0xff]  }
  0x14   :  { %472 = vmatprep.subr.bf16.mxu0 %v1610_v11  ;;  %v1675_v58 = vld [vmem:[%s2308_s0 + $0x78] ss:$12 sps:$4 sm:$0xff]   ;;  %v1677_v59 = vld [vmem:[%s2308_s0 + $0x94] ss:$12 sps:$4 sm:$0xff]   ;;  %v1679_v60 = vld [vmem:[%s2308_s0 + $0x90] ss:$12 sps:$4 sm:$0xff]  }
  0x15   :  { %1526 = vmatpush1.bf16.msra.mxu1 %v1862_v28  ;;  %v1681_v61 = vld [vmem:[%s2308_s0 + $0xac] ss:$12 sps:$4 sm:$0xff]   ;;  %v1683_v62 = vld [vmem:[%s2308_s0 + $0xa8] ss:$12 sps:$4 sm:$0xff]   ;;  %v1687_v2 = vld [vmem:[%s2309_s3] sm:$0xff]   ;;  %vm1231_vm3 = vcmask 1042434  }
  0x16   :  { %863 = vmatprep.subr.bf16.mxu1 %v1703_v1  ;;  %v1685_v63 = vld [vmem:[%s2308_s0 + $0x8] ss:$12 sps:$4 sm:$0xff]   ;;  %v1686_v0 = vld [vmem:[%s2308_s0 + $0x20] ss:$12 sps:$4 sm:$0xff]   ;;  %v1690_v5 = vld [vmem:[%s2309_s3 + $0x18] sm:$0xff]   ;;  %vm1234_vm4 = vcmask 1043459  }
  0x17   :  { %473 = vmatpush1.bf16.msra.mxu0 %v1612_v12  ;;  %v1688_v3 = vld [vmem:[%s2309_s3 + $0x8] sm:$0xff]   ;;  %v1689_v4 = vld [vmem:[%s2309_s3 + $0x10] sm:$0xff]   ;;  %v1691_v6 = vld [vmem:[%s2309_s3 + $0x20] sm:$0xff]   ;;  %vm1237_vm5 = vcmask 1044484   ;;  %vm1240_vm6 = vcmask 1045509   ;;  %vm1243_vm7 = vcmask 1046534  }
  0x18   :  { %474 = vmatprep.subr.bf16.mxu0 %v1613_v13  ;;  %1462 = vmatmul.mubr.msk.bf16.vlgmr.msra.gmra.mrb[0].mxu1 %vm437_vm0, %v1664_v31  ;;  %v1692_v7 = vld [vmem:[%s2309_s3 + $0x28] sm:$0xff]   ;;  %v1693_v8 = vld [vmem:[%s2309_s3 + $0x30] sm:$0xff]   ;;  %v1694_v9 = vld [vmem:[%s2309_s3 + $0x38] sm:$0xff]   ;;  %vm1246_vm8 = vcmask 1047559   ;;  %vm1275_vm9 = vcmask 261120  }
  0x19   :  { %637 = vmatprep.mubr.bf16.mxu1 %v1703_v1  ;;  %864 = vmatpush1.bf16.msra.mxu1 %v1687_v2  ;;  %v1695_v10 = vld [vmem:[%s2309_s3 + $0x40] sm:$0xff]   ;;  %v1696_v11 = vld [vmem:[%s2309_s3 + $0x48] sm:$0xff]   ;;  %v1697_v12 = vld [vmem:[%s2309_s3 + $0x50] sm:$0xff]  }
  0x1a   :  { %865 = vmatprep.subr.bf16.mxu1 %v1703_v1  ;;  %v1698_v13 = vld [vmem:[%s2309_s3 + $0x58] sm:$0xff]  }
  0x1b   :  { %475 = vmatpush1.bf16.msra.mxu0 %v1615_v14 }
  0x1c   :  { %476 = vmatprep.subr.bf16.mxu0 %v1616_v15 }
  0x1d   :  { %866 = vmatpush1.bf16.msra.mxu1 %v1688_v3 }
  0x1e   :  { %867 = vmatprep.subr.bf16.mxu1 %v1703_v1 }
  0x1f   :  { %477 = vmatpush1.bf16.msra.mxu0 %v1618_v21 }
  0x20   :  { %478 = vmatprep.subr.bf16.mxu0 %v1619_v23  ;;  %1463 = vmatmul.mubr.msk.bf16.gmra.mrb[4].mxu1 %vm437_vm0, %v1668_v36 }
  0x21   :  { %647 = vmatprep.mubr.bf16.mxu1 %v1703_v1  ;;  %868 = vmatpush1.bf16.msra.mxu1 %v1689_v4 }
  0x22   :  { %869 = vmatprep.subr.bf16.mxu1 %v1703_v1 }
  0x23   :  { %479 = vmatpush1.bf16.msra.mxu0 %v1621_v24 }
  0x24   :  { %480 = vmatprep.subr.bf16.mxu0 %v1622_v27  ;;  %v107_v27 = vlaneseq }
  0x25   :  { %870 = vmatpush1.bf16.msra.mxu1 %v1690_v5 }
  0x26   :  { %871 = vmatprep.subr.bf16.mxu1 %v1703_v1 }
  0x27   :  { %481 = vmatpush1.bf16.msra.mxu0 %v1624_v29 }
  0x28   :  { %482 = vmatprep.subr.bf16.mxu0 %v1625_v30  ;;  %1464 = vmatmul.mubr.msk.bf16.gmra.mrb[8].mxu1 %vm437_vm0, %v1672_v41  ;;  %v108_v30 = vshrl.u32 %v107_v27, 7 }
  0x29   :  { %657 = vmatprep.mubr.bf16.mxu1 %v1703_v1  ;;  %872 = vmatpush1.bf16.msra.mxu1 %v1691_v6 }
  0x2a   :  { %873 = vmatprep.subr.bf16.mxu1 %v1703_v1  ;;  %v113_v36 = vsub.s32 1, %v108_v30 }
  0x2b   :  { %483 = vmatpush1.bf16.msra.mxu0 %v1627_v32 }
  0x2c   :  { %484 = vmatprep.subr.bf16.mxu0 %v1628_v33  ;;  %v109_v33 = vsub.s32 0, %v108_v30 }
  0x2d   :  { %874 = vmatpush1.bf16.msra.mxu1 %v1692_v7 }
  0x2e   :  { %875 = vmatprep.subr.bf16.mxu1 %v1703_v1 }
  0x2f   :  { %485 = vmatpush1.bf16.msra.mxu0 %v1630_v34 }
  0x30   :  { %486 = vmatprep.subr.bf16.mxu0 %v1631_v35  ;;  %1465 = vmatmul.mubr.msk.bf16.gmra.mrb[12].mxu1 %vm437_vm0, %v1676_v45  ;;  %v105_v35 = vld [vmem:[%s2310_s2] sm:$0x3] }
  0x31   :  { %667 = vmatprep.mubr.bf16.mxu1 %v1703_v1  ;;  %876 = vmatpush1.bf16.msra.mxu1 %v1693_v8 }
  0x32   :  { %877 = vmatprep.subr.bf16.mxu1 %v1703_v1 }
  0x33   :  { %487 = vmatpush1.bf16.msra.mxu0 %v1633_v37 }
  0x34   :  { %488 = vmatprep.subr.bf16.mxu0 %v1634_v38  ;;  %v2072_v38 = vrot.slane %v105_v35, %v109_v33 }
  0x35   :  { %878 = vmatpush1.bf16.msra.mxu1 %v1694_v9 }
  0x36   :  { %879 = vmatprep.subr.bf16.mxu1 %v1703_v1 }
  0x37   :  { %489 = vmatpush1.bf16.msra.mxu0 %v1636_v39  ;;  %v2074_v39 = vrot.slane %v105_v35, %v113_v36 }
  0x38   :  { %490 = vmatprep.subr.bf16.mxu0 %v1637_v40  ;;  %1466 = vmatmul.mubr.msk.bf16.gmra.mrb[16].mxu1 %vm437_vm0, %v1680_v48 }
  0x39   :  { %677 = vmatprep.mubr.bf16.mxu1 %v1703_v1  ;;  %880 = vmatpush1.bf16.msra.mxu1 %v1695_v10 }
  0x3a   :  { %881 = vmatprep.subr.bf16.mxu1 %v1703_v1 }
  0x3b   :  { %491 = vmatpush1.bf16.msra.mxu0 %v1639_v42 }
  0x3c   :  { %492 = vmatprep.subr.bf16.mxu0 %v1640_v43 }
  0x3d   :  { %882 = vmatpush1.bf16.msra.mxu1 %v1696_v11 }
  0x3e   :  { %883 = vmatprep.subr.bf16.mxu1 %v1703_v1 }
  0x3f   :  { %493 = vmatpush1.bf16.msra.mxu0 %v1642_v44 }
  0x40   :  { %575 = vmatprep.subr.bf16.mxu0 %v1814_v18  ;;  %1467 = vmatmul.mubr.msk.bf16.gmra.mrb[20].mxu1 %vm437_vm0, %v1684_v51 }
  0x41   :  { %884 = vmatpush1.bf16.msra.mxu1 %v1697_v12 }
  0x42   :  { %495 = vmatmul.mubr.bf16.vlgmr.msra.gmra.mrb[0].mxu0 %v1643_v46  ;;  %885 = vmatprep.subr.bf16.mxu1 %v1703_v1 }
  0x43   :  { %576 = vmatpush1.bf16.msra.mxu0 %v1809_v17  ;;  %504 = vmatprep.mubr.bf16.mxu0 %v1651_v47 }
  0x44   :  { %577 = vmatprep.subr.bf16.mxu0 %v1819_v19 }
  0x45   :  { %886 = vmatpush1.bf16.msra.mxu1 %v1698_v13 }
  0x47   :  { %578 = vmatpush1.bf16.msra.mxu0 %v1826_v20 }
  0x48   :  { %579 = vmatprep.subr.bf16.mxu0 %v1835_v22 }
  0x4a   :  { %505 = vmatmul.mubr.bf16.gmra.mrb[4].mxu0 %v1654_v49 }
  0x4b   :  { %514 = vmatprep.mubr.bf16.mxu0 %v1660_v50  ;;  %580 = vmatpush1.bf16.msra.mxu0 %v1847_v25 }
  0x4c   :  { %581 = vmatprep.subr.bf16.mxu0 %v1853_v26 }
  0x4f   :  { %582 = vmatpush1.bf16.msra.mxu0 %v1862_v28 }
  0x52   :  { %515 = vmatmul.mubr.bf16.gmra.mrb[8].mxu0 %v1663_v52 }
  0x53   :  { %524 = vmatprep.mubr.bf16.mxu0 %v1665_v53 }
  0x5a   :  { %525 = vmatmul.mubr.bf16.gmra.mrb[12].mxu0 %v1667_v54 }
  0x5b   :  { %534 = vmatprep.mubr.bf16.mxu0 %v1669_v55 }
  0x62   :  { %535 = vmatmul.mubr.bf16.gmra.mrb[16].mxu0 %v1671_v56 }
  0x63   :  { %544 = vmatprep.mubr.bf16.mxu0 %v1673_v57 }
  0x6a   :  { %545 = vmatmul.mubr.bf16.gmra.mrb[20].mxu0 %v1675_v58 }
  0x6b   :  { %554 = vmatprep.mubr.bf16.mxu0 %v1677_v59 }
  0x72   :  { %555 = vmatmul.mubr.bf16.gmra.mrb[24].mxu0 %v1679_v60 }
  0x73   :  { %564 = vmatprep.mubr.bf16.mxu0 %v1681_v61 }
  0x7a   :  { %565 = vmatmul.mubr.bf16.gmra.mrb[28].mxu0 %v1683_v62 }
  0x7b   :  { %607 = vmatprep.mubr.bf16.mxu0 %v1703_v1 }
  0x82   :  { %1460 = vmatmul.mubr.msk.bf16.vlgmr.msra.gmra.mrb[0].mxu0 %vm437_vm0, %v1685_v63 }
  0x83   :  { %617 = vmatprep.mubr.bf16.mxu0 %v1703_v1 }
  0x8a   :  { %1461 = vmatmul.mubr.msk.bf16.gmra.mrb[4].mxu0 %vm437_vm0, %v1686_v0 }
  0xeb   :  { %v629_v14 = vpop.f32.mrb[0].mxu1 }
  0xec   :  { %v631_v15 = vpop.f32.mrb[1].mxu1 }
  0xed   :  { %v633_v16 = vpop.f32.mrb[2].mxu1 }
  0xee   :  { %v635_v17 = vpop.f32.mrb[3].mxu1 }
  0xf3   :  { %v639_v18 = vpop.f32.mrb[4].mxu1 }
  0xf4   :  { %v641_v19 = vpop.f32.mrb[5].mxu1 }
  0xf5   :  { %v643_v20 = vpop.f32.mrb[6].mxu1 }
  0xf6   :  { %v645_v21 = vpop.f32.mrb[7].mxu1 }
  0xfb   :  { %v2045_v22 = vpop.f32.mrb[8].mxu1 }
  0xfc   :  { %v2047_v23 = vpop.f32.mrb[9].mxu1 }
  0xfd   :  { %v2049_v24 = vpop.f32.mrb[10].mxu1 }
  0xfe   :  { %v2051_v1 = vpop.f32.mrb[11].mxu1 }
 0x103   :  { %v2053_v25 = vpop.f32.mrb[12].mxu1 }
 0x104   :  { %v2055_v26 = vpop.f32.mrb[13].mxu1 }
 0x105   :  { %v2057_v28 = vpop.f32.mrb[14].mxu1 }
 0x106   :  { %v2059_v29 = vpop.f32.mrb[15].mxu1 }
 0x10b   :  { %v2061_v31 = vpop.f32.mrb[16].mxu1 }
 0x10c   :  { %v2063_v32 = vpop.f32.mrb[17].mxu1 }
 0x10d   :  { %v2065_v34 = vpop.f32.mrb[18].mxu1 }
 0x10e   :  { %v2070_v37 = vpop.f32.mrb[19].mxu1 }
 0x113   :  { %v2076_v40 = vpop.f32.mrb[20].mxu1 }
 0x114   :  { %v2078_v42 = vpop.f32.mrb[21].mxu1 }
 0x115   :  { %v2081_v45 = vpop.f32.mrb[22].mxu1 }
 0x116   :  { %v2084_v48 = vpop.f32.mrb[23].mxu1 }
 0x125   :  { %v516_v41 = vpop.f32.mrb[8].mxu0 }
 0x126   :  { %v517_v43 = vadd.f32 %v516_v41, %v2072_v38  ;;  %v518_v44 = vpop.f32.mrb[9].mxu0 }
 0x127   :  { %v519_v46 = vadd.f32 %v518_v44, %v2074_v39  ;;  %v520_v47 = vpop.f32.mrb[10].mxu0 }
 0x128   :  { %v521_v49 = vadd.f32 %v520_v47, %v2072_v38  ;;  %v630_v50 = vadd.f32 %v629_v14, %v517_v43  ;;  %v522_v51 = vpop.f32.mrb[11].mxu0 }
 0x129   :  { %v523_v52 = vadd.f32 %v522_v51, %v2074_v39  ;;  %v632_v53 = vadd.f32 %v631_v15, %v519_v46 }
 0x12a   :  { %v634_v54 = vadd.f32 %v633_v16, %v521_v49  ;;  %v696_v56 = vmax.f32 %v630_v50, 0.0 }
 0x12b   :  { %v636_v55 = vadd.f32 %v635_v17, %v523_v52  ;;  %v697_v58 = vmax.f32 %v632_v53, 0.0 }
 0x12c   :  { %v698_v57 = vmax.f32 %v634_v54, 0.0 }
 0x12d   :  { %v699_v59 = vmax.f32 %v636_v55, 0.0  ;;  %v526_v60 = vpop.f32.mrb[12].mxu0 }
 0x12e   :  { %v2088_v61 = vpack.c.bf16 %v698_v57, %v696_v56  ;;  %v527_v62 = vadd.f32 %v526_v60, %v2072_v38  ;;  %v528_v63 = vpop.f32.mrb[13].mxu0 }
 0x12f   :  { %v2091_v0 = vpack.c.bf16 %v699_v59, %v697_v58  ;;  %v529_v2 = vadd.f32 %v528_v63, %v2074_v39  ;;  %v530_v3 = vpop.f32.mrb[14].mxu0 }
 0x130   :  { %v531_v4 = vadd.f32 %v530_v3, %v2072_v38  ;;  %v640_v5 = vadd.f32 %v639_v18, %v527_v62  ;;  %v532_v6 = vpop.f32.mrb[15].mxu0 }
 0x131   :  { %v533_v7 = vadd.f32 %v532_v6, %v2074_v39  ;;  %v642_v8 = vadd.f32 %v641_v19, %v529_v2 }
 0x132   :  { %v644_v9 = vadd.f32 %v643_v20, %v531_v4  ;;  %v700_v11 = vmax.f32 %v640_v5, 0.0 }
 0x133   :  { %v646_v10 = vadd.f32 %v645_v21, %v533_v7  ;;  %v701_v13 = vmax.f32 %v642_v8, 0.0 }
 0x134   :  { %v702_v12 = vmax.f32 %v644_v9, 0.0 }
 0x135   :  { %v703_v14 = vmax.f32 %v646_v10, 0.0  ;;  %v536_v15 = vpop.f32.mrb[16].mxu0 }
 0x136   :  { %v2096_v16 = vpack.c.bf16 %v702_v12, %v700_v11  ;;  %v537_v17 = vadd.f32 %v536_v15, %v2072_v38  ;;  %v538_v27 = vpop.f32.mrb[17].mxu0 }
 0x137   :  { %v2099_v30 = vpack.c.bf16 %v703_v14, %v701_v13  ;;  %v539_v18 = vadd.f32 %v538_v27, %v2074_v39  ;;  %v540_v33 = vpop.f32.mrb[18].mxu0 }
 0x138   :  { %v541_v35 = vadd.f32 %v540_v33, %v2072_v38  ;;  %v650_v19 = vadd.f32 %v2045_v22, %v537_v17  ;;  %v542_v20 = vpop.f32.mrb[19].mxu0 }
 0x139   :  { %v543_v21 = vadd.f32 %v542_v20, %v2074_v39  ;;  %v652_v36 = vadd.f32 %v2047_v23, %v539_v18 }
 0x13a   :  { %v654_v41 = vadd.f32 %v2049_v24, %v541_v35  ;;  %v704_v44 = vmax.f32 %v650_v19, 0.0 }
 0x13b   :  { %v656_v43 = vadd.f32 %v2051_v1, %v543_v21  ;;  %v705_v47 = vmax.f32 %v652_v36, 0.0 }
 0x13c   :  { %v706_v46 = vmax.f32 %v654_v41, 0.0 }
 0x13d   :  { %v707_v49 = vmax.f32 %v656_v43, 0.0  ;;  %v546_v50 = vpop.f32.mrb[20].mxu0 }
 0x13e   :  { %v2108_v51 = vpack.c.bf16 %v706_v46, %v704_v44  ;;  %v547_v52 = vadd.f32 %v546_v50, %v2072_v38  ;;  %v548_v53 = vpop.f32.mrb[21].mxu0 }
 0x13f   :  { %v2111_v22 = vpack.c.bf16 %v707_v49, %v705_v47  ;;  %v549_v54 = vadd.f32 %v548_v53, %v2074_v39  ;;  %v550_v55 = vpop.f32.mrb[22].mxu0 }
 0x140   :  { %v551_v23 = vadd.f32 %v550_v55, %v2072_v38  ;;  %v660_v24 = vadd.f32 %v2053_v25, %v547_v52  ;;  %v552_v1 = vpop.f32.mrb[23].mxu0 }
 0x141   :  { %v553_v56 = vadd.f32 %v552_v1, %v2074_v39  ;;  %v662_v57 = vadd.f32 %v2055_v26, %v549_v54 }
 0x142   :  { %v664_v58 = vadd.f32 %v2057_v28, %v551_v23  ;;  %v708_v60 = vmax.f32 %v660_v24, 0.0 }
 0x143   :  { %v666_v59 = vadd.f32 %v2059_v29, %v553_v56  ;;  %v709_v63 = vmax.f32 %v662_v57, 0.0 }
 0x144   :  { %v710_v62 = vmax.f32 %v664_v58, 0.0 }
 0x145   :  { %v711_v2 = vmax.f32 %v666_v59, 0.0  ;;  %v556_v3 = vpop.f32.mrb[24].mxu0 }
 0x146   :  { %v2120_v4 = vpack.c.bf16 %v710_v62, %v708_v60  ;;  %v557_v5 = vadd.f32 %v556_v3, %v2072_v38  ;;  %v558_v6 = vpop.f32.mrb[25].mxu0 }
 0x147   :  { %v2123_v25 = vpack.c.bf16 %v711_v2, %v709_v63  ;;  %v559_v7 = vadd.f32 %v558_v6, %v2074_v39  ;;  %v560_v8 = vpop.f32.mrb[26].mxu0 }
 0x148   :  { %v561_v26 = vadd.f32 %v560_v8, %v2072_v38  ;;  %v670_v28 = vadd.f32 %v2061_v31, %v557_v5  ;;  %v562_v29 = vpop.f32.mrb[27].mxu0 }
 0x149   :  { %v563_v9 = vadd.f32 %v562_v29, %v2074_v39  ;;  %v672_v10 = vadd.f32 %v2063_v32, %v559_v7 }
 0x14a   :  { %v674_v11 = vadd.f32 %v2065_v34, %v561_v26  ;;  %v712_v13 = vmax.f32 %v670_v28, 0.0 }
 0x14b   :  { %v676_v12 = vadd.f32 %v2070_v37, %v563_v9  ;;  %v713_v15 = vmax.f32 %v672_v10, 0.0 }
 0x14c   :  { %v714_v14 = vmax.f32 %v674_v11, 0.0 }
 0x14d   :  { %v715_v17 = vmax.f32 %v676_v12, 0.0  ;;  %v566_v27 = vpop.f32.mrb[28].mxu0 }
 0x14e   :  { %v732_v18 = vpack.c.bf16 %v714_v14, %v712_v13  ;;  %v567_v33 = vadd.f32 %v566_v27, %v2072_v38  ;;  %v568_v35 = vpop.f32.mrb[29].mxu0 }
 0x14f   :  { %v733_v19 = vpack.c.bf16 %v715_v17, %v713_v15  ;;  %v569_v31 = vadd.f32 %v568_v35, %v2074_v39  ;;  %v570_v20 = vpop.f32.mrb[30].mxu0 }
 0x150   :  { %v571_v21 = vadd.f32 %v570_v20, %v2072_v38  ;;  %v680_v32 = vadd.f32 %v2076_v40, %v567_v33  ;;  %v572_v34 = vpop.f32.mrb[31].mxu0 }
 0x151   :  { %v573_v37 = vadd.f32 %v572_v34, %v2074_v39  ;;  %v682_v36 = vadd.f32 %v2078_v42, %v569_v31 }
 0x152   :  { %v684_v41 = vadd.f32 %v2081_v45, %v571_v21  ;;  %v716_v44 = vmax.f32 %v680_v32, 0.0 }
 0x153   :  { %v686_v43 = vadd.f32 %v2084_v48, %v573_v37  ;;  %v717_v47 = vmax.f32 %v682_v36, 0.0 }
 0x154   :  { %v718_v46 = vmax.f32 %v684_v41, 0.0 }
 0x155   :  { %v719_v49 = vmax.f32 %v686_v43, 0.0  ;;  %v609_v50 = vpop.f32.mrb[0].mxu0 }
 0x156   :  { %v734_v52 = vpack.c.bf16 %v718_v46, %v716_v44  ;;  %v1527_v53 = vadd.f32 %v609_v50, %v2072_v38  ;;  %v611_v54 = vpop.f32.mrb[1].mxu0 }
 0x157   :  { %v735_v55 = vpack.c.bf16 %v719_v49, %v717_v47  ;;  %v1528_v40 = vadd.f32 %v611_v54, %v2074_v39  ;;  %v613_v23 = vpop.f32.mrb[2].mxu0 }
 0x158   :  { %v1529_v24 = vadd.f32 %v613_v23, %v2072_v38  ;;  %v615_v42 = vpop.f32.mrb[3].mxu0  ;;  %v688_v1 = vmax.f32 %v1527_v53, 0.0 }
 0x159   :  { %v1530_v45 = vadd.f32 %v615_v42, %v2074_v39  ;;  %v689_v56 = vmax.f32 %v1528_v40, 0.0 }
 0x15a   :  { %v690_v48 = vmax.f32 %v1529_v24, 0.0  ;;  %v1705_v24 = vmov 0.0  }
 0x15b   :  { %v691_v57 = vmax.f32 %v1530_v45, 0.0  ;;  %1503 = vmatprep.subr.bf16.mxu1 %v1705_v24 }
 0x15c   :  { %v720_v58 = vpack.c.bf16 %v690_v48, %v688_v1 }
 0x15d   :  { %v721_v59 = vpack.c.bf16 %v691_v57, %v689_v56  ;;  %v619_v60 = vpop.f32.mrb[4].mxu0 }
 0x15e   :  { %v1531_v62 = vadd.f32 %v619_v60, %v2072_v38  ;;  %v621_v63 = vpop.f32.mrb[5].mxu0 }
 0x15f   :  { %v1532_v2 = vadd.f32 %v621_v63, %v2074_v39  ;;  %v623_v3 = vpop.f32.mrb[6].mxu0  ;;  %1481 = vmatprep.mubr.msk.bf16.mxu1 %vm437_vm0, %v721_v59 }
 0x160   :  { %v1533_v5 = vadd.f32 %v623_v3, %v2072_v38  ;;  %v625_v6 = vpop.f32.mrb[7].mxu0  ;;  %896 = vmatmul.mubr.bf16.vlgmr.msra.gmra.mrb[24].mxu1 %v720_v58  ;;  %v692_v8 = vmax.f32 %v1531_v62, 0.0  ;;  %v2167_v38 = vld [vmem:[%s2311_s4] ss:$0 sm:$0xff]  ;;  %s1704_s4 = smov 96  }
 0x161   :  { %v1534_v7 = vadd.f32 %v625_v6, %v2074_v39  ;;  %v693_v28 = vmax.f32 %v1532_v2, 0.0  ;;  %v1699_v3 = vld [vmem:[%s2312_s5] sm:$0xff]  }
 0x162   :  { %v694_v26 = vmax.f32 %v1533_v5, 0.0  ;;  %1504 = vmatpush3.bf16.msra.mxu1 %v1699_v3 }
 0x163   :  { %v695_v29 = vmax.f32 %v1534_v7, 0.0  ;;  %1505 = vmatprep.subr.bf16.mxu1 %v1705_v24 }
 0x164   :  { %v722_v9 = vpack.c.bf16 %v694_v26, %v692_v8 }
 0x165   :  { %v723_v10 = vpack.c.bf16 %v695_v29, %v693_v28 }
 0x167   :  { %1482 = vmatprep.mubr.msk.bf16.mxu1 %vm437_vm0, %v723_v10 }
 0x168   :  { %904 = vmatmul.mubr.bf16.gmra.mrb[28].mxu1 %v722_v9 }
 0x169   :  { %1483 = vmatprep.mubr.msk.bf16.mxu1 %vm437_vm0, %v2091_v0 }
 0x170   :  { %912 = vmatmul.mubr.bf16.gmra.mrb[32].mxu1 %v2088_v61 }
 0x171   :  { %1484 = vmatprep.mubr.msk.bf16.mxu1 %vm437_vm0, %v2099_v30 }
 0x178   :  { %920 = vmatmul.mubr.bf16.gmra.mrb[36].mxu1 %v2096_v16 }
 0x179   :  { %1485 = vmatprep.mubr.msk.bf16.mxu1 %vm437_vm0, %v2111_v22 }
 0x180   :  { %928 = vmatmul.mubr.bf16.gmra.mrb[40].mxu1 %v2108_v51 }
 0x181   :  { %1486 = vmatprep.mubr.msk.bf16.mxu1 %vm437_vm0, %v2123_v25 }
 0x188   :  { %936 = vmatmul.mubr.bf16.gmra.mrb[44].mxu1 %v2120_v4 }
 0x189   :  { %1487 = vmatprep.mubr.msk.bf16.mxu1 %vm437_vm0, %v733_v19 }
 0x190   :  { %944 = vmatmul.mubr.bf16.gmra.mrb[48].mxu1 %v732_v18 }
 0x191   :  { %1488 = vmatprep.mubr.msk.bf16.mxu1 %vm437_vm0, %v735_v55 }
 0x198   :  { %952 = vmatmul.mubr.bf16.gmra.mrb[52].mxu1 %v734_v52 }
 0x199   :  { %1507 = vmatprep.mubr.msk.bf16.mxu1 %vm1706_vm1, %v1705_v24 }
 0x233   :  { %v897_v39 = vpop.f32.mrb[24].mxu1 }
 0x234   :  { %v898_v61 = vadd.f32 %v2167_v38, %v897_v39  ;;  %v899_v0 = vpop.f32.mrb[25].mxu1 }
 0x235   :  { %v900_v16 = vpop.f32.mrb[26].mxu1 }
 0x236   :  { %v960_v30 = vmax.f32 %v898_v61, 0.0  ;;  %v901_v51 = vadd.f32 %v2167_v38, %v900_v16  ;;  %v902_v22 = vpop.f32.mrb[27].mxu1 }
 0x238   :  { %v976_v4 = vsel %vm437_vm0, %v960_v30, -inf  ;;  %v961_v25 = vmax.f32 %v901_v51, 0.0 }
 0x239   :  { %v977_v11 = vrot.slane %v976_v4, 4 }
 0x23a   :  { %v983_v12 = vsel %vm437_vm0, %v961_v25, -inf }
 0x23b   :  { %v978_v13 = vmax.f32 %v976_v4, %v977_v11  ;;  %v984_v14 = vrot.slane %v983_v12, 4  ;;  %v905_v15 = vpop.f32.mrb[28].mxu1 }
 0x23c   :  { %v906_v17 = vadd.f32 %v2167_v38, %v905_v15  ;;  %v907_v27 = vpop.f32.mrb[29].mxu1 }
 0x23d   :  { %v985_v18 = vmax.f32 %v983_v12, %v984_v14  ;;  %v908_v33 = vpop.f32.mrb[30].mxu1  ;;  %v979_v35 = vrot.slane %v978_v13, 2 }
 0x23e   :  { %v962_v19 = vmax.f32 %v906_v17, 0.0  ;;  %v909_v31 = vadd.f32 %v2167_v38, %v908_v33  ;;  %v910_v20 = vpop.f32.mrb[31].mxu1 }
 0x23f   :  { %v986_v21 = vrot.slane %v985_v18, 2  ;;  %v980_v32 = vmax.f32 %v978_v13, %v979_v35 }
 0x240   :  { %v990_v34 = vsel %vm437_vm0, %v962_v19, -inf  ;;  %v963_v37 = vmax.f32 %v909_v31, 0.0 }
 0x241   :  { %v991_v36 = vrot.slane %v990_v34, 4  ;;  %v981_v41 = vrot.slane %v980_v32, 1  ;;  %v987_v43 = vmax.f32 %v985_v18, %v986_v21 }
 0x242   :  { %v997_v44 = vsel %vm437_vm0, %v963_v37, -inf }
 0x243   :  { %v992_v46 = vmax.f32 %v990_v34, %v991_v36  ;;  %v998_v47 = vrot.slane %v997_v44, 4  ;;  %v913_v49 = vpop.f32.mrb[32].mxu1  ;;  %v2177_v50 = vmax.f32 %v980_v32, %v981_v41  ;;  %v988_v52 = vrot.slane %v987_v43, 1 }
 0x244   :  { %v914_v53 = vadd.f32 %v2167_v38, %v913_v49  ;;  %v915_v54 = vpop.f32.mrb[33].mxu1 }
 0x245   :  { %v999_v55 = vmax.f32 %v997_v44, %v998_v47  ;;  %1104 = vrot.lane.b32.xlu0 %v2177_v50, %s1704_s4  ;;  %v916_v40 = vpop.f32.mrb[34].mxu1  ;;  %v993_v23 = vrot.slane %v992_v46, 2  ;;  %v2184_v56 = vmax.f32 %v987_v43, %v988_v52 }
 0x246   :  { %v964_v42 = vmax.f32 %v914_v53, 0.0  ;;  %v917_v45 = vadd.f32 %v2167_v38, %v916_v40  ;;  %v918_v1 = vpop.f32.mrb[35].mxu1 }
 0x247   :  { %v1000_v48 = vrot.slane %v999_v55, 2  ;;  %v994_v57 = vmax.f32 %v992_v46, %v993_v23 }
 0x248   :  { %v1004_v58 = vsel %vm437_vm0, %v964_v42, -inf  ;;  %v965_v59 = vmax.f32 %v917_v45, 0.0 }
 0x249   :  { %v1005_v60 = vrot.slane %v1004_v58, 4  ;;  %1106 = vrot.lane.b32.xlu0 %v2184_v56, %s1704_s4  ;;  %v995_v62 = vrot.slane %v994_v57, 1  ;;  %v1001_v63 = vmax.f32 %v999_v55, %v1000_v48 }
 0x24a   :  { %v1011_v2 = vsel %vm437_vm0, %v965_v59, -inf }
 0x24b   :  { %v1006_v5 = vmax.f32 %v1004_v58, %v1005_v60  ;;  %v1012_v6 = vrot.slane %v1011_v2, 4  ;;  %v921_v7 = vpop.f32.mrb[36].mxu1  ;;  %v2193_v8 = vmax.f32 %v994_v57, %v995_v62  ;;  %v1002_v26 = vrot.slane %v1001_v63, 1 }
 0x24c   :  { %v922_v28 = vadd.f32 %v2167_v38, %v921_v7  ;;  %v923_v29 = vpop.f32.mrb[37].mxu1 }
 0x24d   :  { %v1007_v9 = vrot.slane %v1006_v5, 2  ;;  %v1013_v10 = vmax.f32 %v1011_v2, %v1012_v6  ;;  %1108 = vrot.lane.b32.xlu1 %v2193_v8, %s1704_s4  ;;  %v924_v39 = vpop.f32.mrb[38].mxu1  ;;  %v2199_v0 = vmax.f32 %v1001_v63, %v1002_v26 }
 0x24e   :  { %v926_v61 = vpop.f32.mrb[39].mxu1  ;;  %v966_v30 = vmax.f32 %v922_v28, 0.0  ;;  %v925_v51 = vadd.f32 %v2167_v38, %v924_v39 }
 0x24f   :  { %v1014_v16 = vrot.slane %v1013_v10, 2  ;;  %v1008_v22 = vmax.f32 %v1006_v5, %v1007_v9 }
 0x250   :  { %v1018_v11 = vsel %vm437_vm0, %v966_v30, -inf  ;;  %v967_v12 = vmax.f32 %v925_v51, 0.0 }
 0x251   :  { %1110 = vrot.lane.b32.xlu1 %v2199_v0, %s1704_s4  ;;  %v1009_v4 = vrot.slane %v1008_v22, 1  ;;  %v1015_v25 = vmax.f32 %v1013_v10, %v1014_v16  ;;  %v1019_v33 = vrot.slane %v1018_v11, 4 }
 0x252   :  { %v1025_v20 = vsel %vm437_vm0, %v967_v12, -inf }
 0x253   :  { %v929_v13 = vpop.f32.mrb[40].mxu1  ;;  %v2205_v14 = vmax.f32 %v1008_v22, %v1009_v4  ;;  %v1016_v15 = vrot.slane %v1015_v25, 1  ;;  %v1020_v36 = vmax.f32 %v1018_v11, %v1019_v33  ;;  %v1026_v41 = vrot.slane %v1025_v20, 4 }
 0x254   :  { %v930_v17 = vadd.f32 %v2167_v38, %v929_v13  ;;  %v931_v27 = vpop.f32.mrb[41].mxu1 }
 0x255   :  { %v932_v18 = vpop.f32.mrb[42].mxu1  ;;  %1112 = vrot.lane.b32.xlu0 %v2205_v14, %s1704_s4  ;;  %v2212_v21 = vmax.f32 %v1015_v25, %v1016_v15  ;;  %v1021_v40 = vrot.slane %v1020_v36, 2  ;;  %v1027_v23 = vmax.f32 %v1025_v20, %v1026_v41  ;;  %v1700_v27 = vld [vmem:[%s2312_s5 + $0x8] sm:$0xff]  }
 0x256   :  { %v968_v35 = vmax.f32 %v930_v17, 0.0  ;;  %v933_v19 = vadd.f32 %v2167_v38, %v932_v18  ;;  %v934_v31 = vpop.f32.mrb[43].mxu1  ;;  %1506 = vmatpush3.bf16.msra.mxu1 %v1700_v27 }
 0x257   :  { %v1028_v2 = vrot.slane %v1027_v23, 2  ;;  %v1022_v5 = vmax.f32 %v1020_v36, %v1021_v40  ;;  %1511 = vmatprep.subr.bf16.mxu1 %v1705_v24 }
 0x258   :  { %v1032_v32 = vsel %vm437_vm0, %v968_v35, -inf  ;;  %v969_v34 = vmax.f32 %v933_v19, 0.0 }
 0x259   :  { %v1033_v37 = vrot.slane %v1032_v32, 4  ;;  %1114 = vrot.lane.b32.xlu0 %v2212_v21, %s1704_s4  ;;  %v1023_v4 = vrot.slane %v1022_v5, 1  ;;  %v1029_v25 = vmax.f32 %v1027_v23, %v1028_v2 }
 0x25a   :  { %v1039_v43 = vsel %vm437_vm0, %v969_v34, -inf }
 0x25b   :  { %v1034_v44 = vmax.f32 %v1032_v32, %v1033_v37  ;;  %v1040_v46 = vrot.slane %v1039_v43, 4  ;;  %v937_v47 = vpop.f32.mrb[44].mxu1  ;;  %v2237_v31 = vmax.f32 %v1022_v5, %v1023_v4  ;;  %v1030_v20 = vrot.slane %v1029_v25, 1 }
 0x25c   :  { %v938_v49 = vadd.f32 %v2167_v38, %v937_v47  ;;  %v939_v52 = vpop.f32.mrb[45].mxu1 }
 0x25d   :  { %v1035_v53 = vrot.slane %v1034_v44, 2  ;;  %v1041_v54 = vmax.f32 %v1039_v43, %v1040_v46  ;;  %v940_v55 = vpop.f32.mrb[46].mxu1  ;;  %v2245_v23 = vmax.f32 %v1029_v25, %v1030_v20 }
 0x25e   :  { %v970_v42 = vmax.f32 %v938_v49, 0.0  ;;  %v941_v45 = vadd.f32 %v2167_v38, %v940_v55  ;;  %v942_v1 = vpop.f32.mrb[47].mxu1 }
 0x25f   :  { %v1042_v48 = vrot.slane %v1041_v54, 2  ;;  %v1036_v57 = vmax.f32 %v1034_v44, %v1035_v53 }
 0x260   :  { %v1046_v58 = vsel %vm437_vm0, %v970_v42, -inf  ;;  %v971_v59 = vmax.f32 %v941_v45, 0.0 }
 0x261   :  { %v1047_v60 = vrot.slane %v1046_v58, 4  ;;  %v1037_v62 = vrot.slane %v1036_v57, 1  ;;  %v1043_v63 = vmax.f32 %v1041_v54, %v1042_v48 }
 0x262   :  { %v1053_v3 = vsel %vm437_vm0, %v971_v59, -inf }
 0x263   :  { %v1048_v6 = vmax.f32 %v1046_v58, %v1047_v60  ;;  %v1054_v7 = vrot.slane %v1053_v3, 4  ;;  %v945_v26 = vpop.f32.mrb[48].mxu1  ;;  %v2222_v28 = vmax.f32 %v1036_v57, %v1037_v62  ;;  %v1044_v29 = vrot.slane %v1043_v63, 1 }
 0x264   :  { %v946_v9 = vadd.f32 %v2167_v38, %v945_v26  ;;  %v947_v10 = vpop.f32.mrb[49].mxu1 }
 0x265   :  { %v1049_v39 = vrot.slane %v1048_v6, 2  ;;  %v1055_v61 = vmax.f32 %v1053_v3, %v1054_v7  ;;  %v948_v16 = vpop.f32.mrb[50].mxu1  ;;  %1120 = vrot.lane.b32.xlu0 %v2222_v28, %s1704_s4  ;;  %v2228_v12 = vmax.f32 %v1043_v63, %v1044_v29 }
 0x266   :  { %v972_v30 = vmax.f32 %v946_v9, 0.0  ;;  %v949_v51 = vadd.f32 %v2167_v38, %v948_v16  ;;  %v950_v22 = vpop.f32.mrb[51].mxu1 }
 0x267   :  { %v1056_v11 = vrot.slane %v1055_v61, 2  ;;  %v1050_v13 = vmax.f32 %v1048_v6, %v1049_v39 }
 0x268   :  { %v1060_v15 = vsel %vm437_vm0, %v972_v30, -inf  ;;  %v973_v17 = vmax.f32 %v949_v51, 0.0 }
 0x269   :  { %v1061_v18 = vrot.slane %v1060_v15, 4  ;;  %1122 = vrot.lane.b32.xlu0 %v2228_v12, %s1704_s4  ;;  %v1051_v33 = vrot.slane %v1050_v13, 1  ;;  %v1057_v35 = vmax.f32 %v1055_v61, %v1056_v11 }
 0x26a   :  { %v1067_v19 = vsel %vm437_vm0, %v973_v17, -inf }
 0x26b   :  { %v1062_v32 = vmax.f32 %v1060_v15, %v1061_v18  ;;  %v1068_v34 = vrot.slane %v1067_v19, 4  ;;  %v953_v37 = vpop.f32.mrb[52].mxu1  ;;  %v1052_v36 = vmax.f32 %v1050_v13, %v1051_v33  ;;  %v1058_v41 = vrot.slane %v1057_v35, 1 }
 0x26c   :  { %v954_v43 = vadd.f32 %v2167_v38, %v953_v37  ;;  %v955_v44 = vpop.f32.mrb[53].mxu1 }
 0x26d   :  { %v1063_v46 = vrot.slane %v1062_v32, 2  ;;  %v1069_v47 = vmax.f32 %v1067_v19, %v1068_v34  ;;  %v956_v49 = vpop.f32.mrb[54].mxu1  ;;  %1124 = vrot.lane.b32.xlu1 %v1052_v36, %s1704_s4  ;;  %1116 = vrot.lane.b32.xlu0 %v2237_v31, %s1704_s4  ;;  %v1059_v40 = vmax.f32 %v1057_v35, %v1058_v41 }
 0x26e   :  { %v974_v52 = vmax.f32 %v954_v43, 0.0  ;;  %v957_v53 = vadd.f32 %v2167_v38, %v956_v49  ;;  %v958_v54 = vpop.f32.mrb[55].mxu1 }
 0x26f   :  { %v1070_v55 = vrot.slane %v1069_v47, 2  ;;  %v1064_v42 = vmax.f32 %v1062_v32, %v1063_v46 }
 0x270   :  { %v1074_v45 = vsel %vm437_vm0, %v974_v52, -inf  ;;  %v975_v1 = vmax.f32 %v957_v53, 0.0 }
 0x271   :  { %v1075_v48 = vrot.slane %v1074_v45, 4  ;;  %1126 = vrot.lane.b32.xlu1 %v1059_v40, %s1704_s4  ;;  %1118 = vrot.lane.b32.xlu0 %v2245_v23, %s1704_s4  ;;  %v1065_v57 = vrot.slane %v1064_v42, 1  ;;  %v1071_v58 = vmax.f32 %v1069_v47, %v1070_v55 }
 0x272   :  { %v1081_v59 = vsel %vm437_vm0, %v975_v1, -inf }
 0x273   :  { %v1076_v38 = vmax.f32 %v1074_v45, %v1075_v48  ;;  %v1082_v60 = vrot.slane %v1081_v59, 4  ;;  %v1066_v62 = vmax.f32 %v1064_v42, %v1065_v57  ;;  %v1072_v63 = vrot.slane %v1071_v58, 1 }
 0x275   :  { %v1077_v2 = vrot.slane %v1076_v38, 2  ;;  %v1083_v3 = vmax.f32 %v1081_v59, %v1082_v60  ;;  %1128 = vrot.lane.b32.xlu1 %v1066_v62, %s1704_s4  ;;  %v1073_v6 = vmax.f32 %v1071_v58, %v1072_v63 }
 0x277   :  { %v1084_v5 = vrot.slane %v1083_v3, 2  ;;  %v1078_v7 = vmax.f32 %v1076_v38, %v1077_v2 }
 0x279   :  { %1130 = vrot.lane.b32.xlu1 %v1073_v6, %s1704_s4  ;;  %v1079_v26 = vrot.slane %v1078_v7, 1  ;;  %v1085_v29 = vmax.f32 %v1083_v3, %v1084_v5 }
 0x27b   :  { %v1080_v9 = vmax.f32 %v1078_v7, %v1079_v26  ;;  %v1086_v10 = vrot.slane %v1085_v29, 1 }
 0x27d   :  { %1132 = vrot.lane.b32.xlu1 %v1080_v9, %s1704_s4  ;;  %v2257_v39 = vmax.f32 %v1085_v29, %v1086_v10 }
 0x281   :  { %1134 = vrot.lane.b32.xlu1 %v2257_v39, %s1704_s4 }
 0x2b7   :  { %v1105_v61 = vpop.permute.xlu0 %1104 }
 0x2b8   :  { %v1152_v32 = vmul.f32 %v1105_v61, %v2177_v50 }
 0x2ba   :  { %v1168_v52 = vpack.c.bf16 %v1152_v32, %v1152_v32 }
 0x2bb   :  { %v1107_v16 = vpop.permute.xlu0 %1106 }
 0x2bc   :  { %v1153_v27 = vmul.f32 %v1107_v16, %v2184_v56  ;;  %v1211_v59 = vunpack.c.l.b16 %v1168_v52  ;;  %v1702_v52 = vld [vmem:[%s2313_s7 + $0x8] sm:$0xff]  }
 0x2be   :  { %v1169_v37 = vpack.c.bf16 %v1153_v27, %v1153_v27 }
 0x2bf   :  { %v1109_v22 = vpop.permute.xlu1 %1108 }
 0x2c0   :  { %v1154_v18 = vmul.f32 %v1109_v22, %v2193_v8 }
 0x2c2   :  { %v1170_v41 = vpack.c.bf16 %v1154_v18, %v1154_v18 }
 0x2c3   :  { %v1111_v25 = vpop.permute.xlu1 %1110 }
 0x2c4   :  { %v1155_v35 = vmul.f32 %v1111_v25, %v2199_v0  ;;  %v1213_v55 = vunpack.c.l.b16 %v1170_v41 }
 0x2c6   :  { %v1171_v8 = vpack.c.bf16 %v1155_v35, %v1155_v35  ;;  %v1230_v63 = vrot.slane %v1213_v55, 6 }
 0x2c7   :  { %v1113_v30 = vpop.permute.xlu0 %1112 }
 0x2c8   :  { %v1156_v43 = vmul.f32 %v1113_v30, %v2205_v14  ;;  %v1212_v14 = vunpack.c.l.b16 %v1169_v37 }
 0x2cb   :  { %v1115_v51 = vpop.permute.xlu0 %1114 }
 0x2cc   :  { %v1157_v56 = vmul.f32 %v1115_v51, %v2212_v21 }
 0x2ce   :  { %v1173_v21 = vpack.c.bf16 %v1157_v56, %v1157_v56 }
 0x2d0   :  { %v1216_v5 = vunpack.c.l.b16 %v1173_v21 }
 0x2d7   :  { %v1121_v4 = vpop.permute.xlu0 %1120 }
 0x2db   :  { %v1123_v11 = vpop.permute.xlu0 %1122 }
 0x2dc   :  { %v1161_v33 = vmul.f32 %v1123_v11, %v2228_v12  ;;  %v1160_v12 = vmul.f32 %v1121_v4, %v2222_v28  ;;  %v1214_v28 = vunpack.c.l.b16 %v1171_v8 }
 0x2de   :  { %v1177_v47 = vpack.c.bf16 %v1161_v33, %v1161_v33  ;;  %v1176_v48 = vpack.c.bf16 %v1160_v12, %v1160_v12  ;;  %v1233_v29 = vrot.slane %v1214_v28, 5 }
 0x2df   :  { %v1125_v13 = vpop.permute.xlu1 %1124  ;;  %v1117_v15 = vpop.permute.xlu0 %1116 }
 0x2e0   :  { %v1162_v19 = vmul.f32 %v1125_v13, %v1052_v36  ;;  %v1158_v0 = vmul.f32 %v1117_v15, %v2237_v31  ;;  %v1220_v45 = vunpack.c.l.b16 %v1177_v47  ;;  %v1219_v10 = vunpack.c.l.b16 %v1176_v48 }
 0x2e1   :  { %v1239_v15 = vrot.slane %v1216_v5, 3 }
 0x2e2   :  { %v1178_v49 = vpack.c.bf16 %v1162_v19, %v1162_v19  ;;  %v1174_v57 = vpack.c.bf16 %v1158_v0, %v1158_v0 }
 0x2e3   :  { %v1127_v17 = vpop.permute.xlu1 %1126  ;;  %v1119_v44 = vpop.permute.xlu0 %1118 }
 0x2e4   :  { %v1163_v34 = vmul.f32 %v1127_v17, %v1059_v40  ;;  %v1159_v53 = vmul.f32 %v1119_v44, %v2245_v23  ;;  %v1172_v40 = vpack.c.bf16 %v1156_v43, %v1156_v43  ;;  %v1221_v31 = vunpack.c.l.b16 %v1178_v49 }
 0x2e5   :  { %v1217_v16 = vunpack.c.l.b16 %v1174_v57 }
 0x2e6   :  { %v1179_v50 = vpack.c.bf16 %v1163_v34, %v1163_v34  ;;  %v1175_v60 = vpack.c.bf16 %v1159_v53, %v1159_v53  ;;  %v1215_v2 = vunpack.c.l.b16 %v1172_v40  ;;  %v1250_v61 = vrot.slane %v1221_v31, 6 }
 0x2e7   :  { %v1129_v20 = vpop.permute.xlu1 %1128  ;;  %v1242_v19 = vrot.slane %v1217_v16, 2 }
 0x2e8   :  { %v1164_v46 = vmul.f32 %v1129_v20, %v1066_v62  ;;  %v1222_v38 = vunpack.c.l.b16 %v1179_v50  ;;  %v1227_v62 = vrot.slane %v1212_v14, 7  ;;  %v1218_v22 = vunpack.c.l.b16 %v1175_v60  ;;  %v1489_v50 = vld [vmem:[%s2314_s6] ss:$0 sm:$0xff] }
 0x2e9   :  { %v1236_v11 = vrot.slane %v1215_v2, 4 }
 0x2ea   :  { %v1180_v42 = vpack.c.bf16 %v1164_v46, %v1164_v46  ;;  %v1252_v51 = vrot.slane %v1222_v38, 5  ;;  %v1245_v34 = vrot.slane %v1218_v22, 1 }
 0x2eb   :  { %v1131_v36 = vpop.permute.xlu1 %1130 }
 0x2ec   :  { %v1165_v54 = vmul.f32 %v1131_v36, %v1073_v6  ;;  %v1223_v3 = vunpack.c.l.b16 %v1180_v42  ;;  %v1248_v6 = vrot.slane %v1220_v45, 7  ;;  %v1701_v36 = vld [vmem:[%s2313_s7] sm:$0xff]  }
 0x2ee   :  { %v1181_v1 = vpack.c.bf16 %v1165_v54, %v1165_v54  ;;  %v1254_v13 = vrot.slane %v1223_v3, 4  ;;  %v1249_v17 = vsel %vm1228_vm2, %v1248_v6, %v1219_v10 }
 0x2ef   :  { %v1133_v58 = vpop.permute.xlu1 %1132  ;;  %v1251_v35 = vsel %vm1231_vm3, %v1250_v61, %v1249_v17 }
 0x2f0   :  { %v1166_v23 = vmul.f32 %v1133_v58, %v1080_v9  ;;  %v1224_v7 = vunpack.c.l.b16 %v1181_v1  ;;  %v1229_v9 = vsel %vm1228_vm2, %v1227_v62, %v1211_v59 }
 0x2f1   :  { %v1232_v33 = vsel %vm1231_vm3, %v1230_v63, %v1229_v9 }
 0x2f2   :  { %v1182_v26 = vpack.c.bf16 %v1166_v23, %v1166_v23  ;;  %v1256_v27 = vrot.slane %v1224_v7, 3  ;;  %v1235_v32 = vsel %vm1234_vm4, %v1233_v29, %v1232_v33 }
 0x2f3   :  { %v1135_v30 = vpop.permute.xlu1 %1134  ;;  %v1238_v41 = vsel %vm1237_vm5, %v1236_v11, %v1235_v32 }
 0x2f4   :  { %v1225_v4 = vunpack.c.l.b16 %v1182_v26  ;;  %v1167_v25 = vmul.f32 %v1135_v30, %v2257_v39  ;;  %v1253_v39 = vsel %vm1234_vm4, %v1252_v51, %v1251_v35  ;;  %v1241_v44 = vsel %vm1240_vm6, %v1239_v15, %v1238_v41 }
 0x2f5   :  { %v1255_v43 = vsel %vm1237_vm5, %v1254_v13, %v1253_v39  ;;  %v1244_v47 = vsel %vm1243_vm7, %v1242_v19, %v1241_v44 }
 0x2f6   :  { %v1183_v18 = vpack.c.bf16 %v1167_v25, %v1167_v25  ;;  %v1258_v20 = vrot.slane %v1225_v4, 2  ;;  %v1257_v46 = vsel %vm1240_vm6, %v1256_v27, %v1255_v43  ;;  %v1247_v12 = vsel %vm1246_vm8, %v1245_v34, %v1244_v47 }
 0x2f8   :  { %v1226_v37 = vunpack.c.l.b16 %v1183_v18  ;;  %v1259_v8 = vsel %vm1243_vm7, %v1258_v20, %v1257_v46 }
 0x2fa   :  { %v1260_v56 = vrot.slane %v1226_v37, 1 }
 0x2fc   :  { %v1261_v49 = vsel %vm1246_vm8, %v1260_v56, %v1259_v8 }
 0x2fd   :  { %v1262_v0 = vpack.c.b16 %v1261_v49, %v1247_v12 }
 0x2ff   :  { %1508 = vmatmul.mubr.msk.bf16.vlgmr.msra.gmra.mrb[56].mxu1 %vm1275_vm9, %v1262_v0 }
 0x300   :  { %1515 = vmatprep.mubr.msk.bf16.mxu1 %vm1706_vm1, %v1705_v24  ;;  %1512 = vmatpush3.bf16.msra.mxu1 %v1701_v36 }
 0x301   :  { %1513 = vmatprep.subr.bf16.mxu1 %v1705_v24  ;;  %v1493_v24 = vld [vmem:[%s2315_s8] ss:$0 sm:$0xff] }
 0x304   :  { %1514 = vmatpush3.bf16.msra.mxu1 %v1702_v52 }
 0x3d2   :  { %v1313_v53 = vpop.f32.mrb[56].mxu1 }
 0x3d3   :  { %v1314_v54 = vadd.f32 %v1489_v50, %v1313_v53  ;;  %v1509_v14 = vpop.f32.mrb[57].mxu1 }
 0x3d4   :  { %v1316_v55 = vpop.f32.mrb[58].mxu1 }
 0x3d5   :  { %v1317_v40 = vadd.f32 %v1489_v50, %v1316_v55  ;;  %v1510_v42 = vpop.f32.mrb[59].mxu1  ;;  %v1320_v21 = vmax.f32 %v1314_v54, 0.0 }
 0x3d7   :  { %v1321_v45 = vmax.f32 %v1317_v40, 0.0 }
 0x3d9   :  { %v1322_v1 = vpack.c.bf16 %v1321_v45, %v1320_v21 }
 0x3db   :  { %1516 = vmatmul.mubr.msk.bf16.vlgmr.msra.gmra.mrb[60].mxu1 %vm1275_vm9, %v1322_v1 }
 0x4ae   :  { %v1383_v28 = vpop.f32.mrb[60].mxu1 }
 0x4af   :  { %v1384_v48 = vadd.f32 %v1493_v24, %v1383_v28  ;;  %v1517_v31 = vpop.f32.mrb[61].mxu1 }
 0x4b0   :  { %v1386_v57 = vpop.f32.mrb[62].mxu1 }
 0x4b1   :  { %1390 = vst [vmem:[%s2316_s9] sm:$0xff] %v1384_v48  ;;  %v1387_v58 = vadd.f32 %v1493_v24, %v1386_v57  ;;  %v1518_v59 = vpop.f32.mrb[63].mxu1 }
 0x4b3   :  { %1391 = vst [vmem:[%s2316_s9 + $0x8] sm:$0xff] %v1387_v58 }

</bundles_post_ra>
